<compile_context>
chip_gen: v7x
topology: tpu7x:2x2x1
jax: 0.10.0
libtpu: 0.0.40
codegen_flags: <defaults>
</compile_context>

<pallas_src>
import functools

import numpy as np

import jax
import jax.numpy as jnp
from jax.experimental import pallas as pl
from jax.experimental.pallas import tpu as pltpu

_PI = 3.14159265  # matches the hard-coded constant in the PyTorch module


def sp_loss_kernel(pr_ref, rel_ref, basis_ref, loss_ref, *, f_pad, inv_n):
    basis = basis_ref[...]                                    # (T, 2*F_pad) bf16

    # Two MXU dots against the shared windowed DFT basis, f32 accumulation.
    r_pr = jnp.dot(pr_ref[...], basis,
                   preferred_element_type=jnp.float32)        # (B, 2*F_pad)
    r_rl = jnp.dot(rel_ref[...], basis,
                   preferred_element_type=jnp.float32)        # (B, 2*F_pad)

    # Lane-aligned column split (f_pad is a multiple of 128): sin | cos halves.
    mag_pr = r_pr[:, :f_pad] ** 2 + r_pr[:, f_pad:] ** 2      # (B, F_pad) f32
    mag_rl = r_rl[:, :f_pad] ** 2 + r_rl[:, f_pad:] ** 2      # (B, F_pad) f32

    # Padded frequency columns are exactly zero in both halves -> diff == 0
    # there; the mean divides by the TRUE n = B*F.
    diff = mag_pr - mag_rl
    loss_ref[0, 0] = jnp.sum(diff * diff) * inv_n


@functools.lru_cache(maxsize=None)
def _windowed_dft_basis(t, low_bound, high_bound, fps, f_pad):
    """(T, 2*F_pad) bf16 basis: [hann*sin | hann*cos], built once and cached."""
    f = high_bound - low_bound
    bpm_range = np.arange(low_bound, high_bound, dtype=np.float32) / 60.0
    f_t = bpm_range / np.float32(fps)                          # (F,)
    two_pi_n = 2.0 * _PI * np.arange(t, dtype=np.float32)      # (T,)
    hann = np.hanning(t).astype(np.float32)                    # symmetric window

    phase = two_pi_n[:, None] * f_t[None, :]                   # (T, F)
    basis = np.zeros((t, 2 * f_pad), np.float32)
    basis[:, :f] = hann[:, None] * np.sin(phase)
    basis[:, f_pad:f_pad + f] = hann[:, None] * np.cos(phase)
    # bf16 operands: single-pass MXU + half the HBM->VMEM bytes.
    return jnp.asarray(basis, dtype=jnp.bfloat16)


@functools.lru_cache(maxsize=None)
def _build_pallas_fn(batch, t, f, f_pad):
    """Memoized pallas_call callable for a given problem signature."""
    kernel = functools.partial(sp_loss_kernel, f_pad=f_pad,
                               inv_n=1.0 / float(batch * f))
    vmem = pl.BlockSpec(memory_space=pltpu.MemorySpace.VMEM)
    smem = pl.BlockSpec(memory_space=pltpu.MemorySpace.SMEM)
    # Gridless / fully VMEM-resident by design at these sizes (latency-bound).
    # TODO(synk): if T or B ever grow large, add a "parallel" batch grid and a
    # contraction-axis grid with a f32 VMEM accumulator (pl.when init/finalize).
    return pl.pallas_call(
        kernel,
        out_shape=jax.ShapeDtypeStruct((1, 1), jnp.float32),
        in_specs=[vmem, vmem, vmem],
        out_specs=smem,
    )


def sp_loss_pretrain(wave_pr, wave_rel, *, low_bound=40, high_bound=150, fps=30):
    """JAX/Pallas equivalent of SP_loss_pretrain.forward (loss_type=1)."""
    B, T = wave_pr.shape
    F = high_bound - low_bound
    F_pad = max(128, pl.cdiv(F, 128) * 128)   # lane-tile-aligned frequency axis

    basis = _windowed_dft_basis(T, low_bound, high_bound, fps, F_pad)
    fn = _build_pallas_fn(B, T, F, F_pad)

    loss = fn(wave_pr.astype(jnp.bfloat16),
              wave_rel.astype(jnp.bfloat16),
              basis)
    return loss[0, 0]


def _reference(wave_pr, wave_rel, *, low_bound=40, high_bound=150, fps=30):
    """Pure-JAX f32 reference mirroring the PyTorch forward."""
    B, T = wave_pr.shape
    bpm_range = jnp.arange(low_bound, high_bound, dtype=jnp.float32) / 60.0
    f_t = (bpm_range / fps).reshape(1, -1, 1)                      # (1, F, 1)
    two_pi_n = (2.0 * _PI * jnp.arange(T, dtype=jnp.float32)).reshape(1, 1, -1)
    hanning = jnp.asarray(np.hanning(T), dtype=jnp.float32).reshape(1, -1)

    preds = (wave_pr * hanning).reshape(B, 1, T)
    rel = (wave_rel * hanning).reshape(B, 1, T)
    arg = f_t * two_pi_n                                           # (1, F, T)
    abs_pr = jnp.sum(preds * jnp.sin(arg), -1) ** 2 + jnp.sum(preds * jnp.cos(arg), -1) ** 2
    abs_rl = jnp.sum(rel * jnp.sin(arg), -1) ** 2 + jnp.sum(rel * jnp.cos(arg), -1) ** 2
    return jnp.mean((abs_pr - abs_rl) ** 2)


if __name__ == "__main__":
    # Small shapes: batch=2, clip_length (time) = 64, F = 150 - 40 = 110 freqs.
    B, T = 2, 64
    key = jax.random.PRNGKey(0)
    k1, k2 = jax.random.split(key)
    wave_pr = jax.random.normal(k1, (B, T), dtype=jnp.float32)
    wave_rel = jax.random.normal(k2, (B, T), dtype=jnp.float32)

    loss = sp_loss_pretrain(wave_pr, wave_rel)
    loss = jax.block_until_ready(loss)

    ref = jax.block_until_ready(_reference(wave_pr, wave_rel))
    assert jnp.allclose(loss, ref, rtol=5e-2, atol=5e-2), (loss, ref)

    print("KERNEL_OK")
</pallas_src>

<mosaic_0001>
module attributes {stable_mosaic.version = 11 : i64} {
  func.func @sp_loss_kernel(%arg0: memref<2x64xbf16, #tpu.memory_space<vmem>>, %arg1: memref<2x64xbf16, #tpu.memory_space<vmem>>, %arg2: memref<64x256xbf16, #tpu.memory_space<vmem>>, %arg3: memref<1x1xf32, #tpu.memory_space<smem>>) attributes {dimension_semantics = [], scalar_prefetch = 0 : i64, scratch_operands = 0 : i64, tpu.core_type = #tpu.core_type<tc>} {
    %c0 = arith.constant 0 : index
    %c0_0 = arith.constant 0 : index
    %0 = vector.load %arg2[%c0, %c0_0] : memref<64x256xbf16, #tpu.memory_space<vmem>>, vector<64x256xbf16>
    %c0_1 = arith.constant 0 : index
    %c0_2 = arith.constant 0 : index
    %1 = vector.load %arg0[%c0_1, %c0_2] : memref<2x64xbf16, #tpu.memory_space<vmem>>, vector<2x64xbf16>
    %cst = arith.constant dense<0.000000e+00> : vector<2x256xf32>
    %2 = tpu.matmul %1, %0, %cst {dimension_numbers = #tpu.dot_dimension_numbers<[1], [0], [0], [1], [0, 0, 1, 1], [], []>} : vector<2x64xbf16>, vector<64x256xbf16>, vector<2x256xf32> -> vector<2x256xf32>
    %c0_3 = arith.constant 0 : index
    %c0_4 = arith.constant 0 : index
    %3 = vector.load %arg1[%c0_3, %c0_4] : memref<2x64xbf16, #tpu.memory_space<vmem>>, vector<2x64xbf16>
    %cst_5 = arith.constant dense<0.000000e+00> : vector<2x256xf32>
    %4 = tpu.matmul %3, %0, %cst_5 {dimension_numbers = #tpu.dot_dimension_numbers<[1], [0], [0], [1], [0, 0, 1, 1], [], []>} : vector<2x64xbf16>, vector<64x256xbf16>, vector<2x256xf32> -> vector<2x256xf32>
    %5 = vector.extract_strided_slice %2 {offsets = [0, 0], sizes = [2, 128], strides = [1, 1]} : vector<2x256xf32> to vector<2x128xf32>
    %6 = arith.mulf %5, %5 : vector<2x128xf32>
    %7 = vector.extract_strided_slice %2 {offsets = [0, 128], sizes = [2, 128], strides = [1, 1]} : vector<2x256xf32> to vector<2x128xf32>
    %8 = arith.mulf %7, %7 : vector<2x128xf32>
    %9 = arith.addf %6, %8 : vector<2x128xf32>
    %10 = vector.extract_strided_slice %4 {offsets = [0, 0], sizes = [2, 128], strides = [1, 1]} : vector<2x256xf32> to vector<2x128xf32>
    %11 = arith.mulf %10, %10 : vector<2x128xf32>
    %12 = vector.extract_strided_slice %4 {offsets = [0, 128], sizes = [2, 128], strides = [1, 1]} : vector<2x256xf32> to vector<2x128xf32>
    %13 = arith.mulf %12, %12 : vector<2x128xf32>
    %14 = arith.addf %11, %13 : vector<2x128xf32>
    %15 = arith.subf %9, %14 : vector<2x128xf32>
    %16 = arith.mulf %15, %15 : vector<2x128xf32>
    %17 = vector.shape_cast %16 : vector<2x128xf32> to vector<1x2x128xf32>
    %cst_6 = arith.constant dense<0.000000e+00> : vector<1xf32>
    %18 = vector.multi_reduction <add>, %17, %cst_6 [1, 2] : vector<1x2x128xf32> to vector<1xf32>
    %19 = vector.shape_cast %18 : vector<1xf32> to vector<1x1x1xf32>
    %20 = vector.extract %19[0, 0, 0] : f32 from vector<1x1x1xf32>
    %cst_7 = arith.constant 0.0045454544 : f32
    %21 = arith.mulf %20, %cst_7 : f32
    %c0_8 = arith.constant 0 : index
    %c0_9 = arith.constant 0 : index
    %22 = memref.load %arg3[%c0_8, %c0_9] : memref<1x1xf32, #tpu.memory_space<smem>>
    memref.store %21, %arg3[%c0_8, %c0_9] : memref<1x1xf32, #tpu.memory_space<smem>>
    return
  }
}

</mosaic_0001>

<bundles_post_ra>
// kernel: tpu_custom_call.1
= control target key start
LH: loop header
LB: loop body
LE: loop exit
PB: predicated region body
PF: predicated region fallthrough
CT: control target
= control target key end

     0   :  { %8 = vsyncpa [#allocation3], 0  ;;  %s380_s0 = inlined_call_operand.hbm [shape: bf16[2,64], index: 0, kind: input, shape index: {}]   ;;  %s381_s1 = inlined_call_operand.vmem [shape: bf16[2,64], index: 1, kind: input, shape index: {}]   ;;  %s382_s2 = inlined_call_operand.hbm [shape: bf16[64,256], index: 2, kind: input, shape index: {}]   ;;  %s383_s3 = inlined_call_operand.hbm [shape: f32[1,1], index: 3, kind: output, shape index: {}]  }
   0x1   :  { %9 = vsyncpa [#allocation6], 0 }
   0x2   :  { %10 = vsyncpa [#allocation4], 0  ;;  %s308_s12 = smov [#allocation2]   ;;  %s309_s14 = smov [#allocation5]  }
   0x3   :  { %s17_s13 = sshll.u32 %s308_s12, 4  ;;  %s28_s15 = sshll.u32 %s309_s14, 4  ;;  %s18_s13 = int_to_ptr.vmem [resolvable:$true] %s17_s13  ;;  %s334_s15 = int_to_ptr.vmem [resolvable:$true] %s28_s15 }
   0x4   :  { %s248_s18 = scalar_lea.hbm %s380_s0, 16 }
   0x5   :  { %p249_p0 = scmp.ne.s32.totalorder %s380_s0, %s248_s18  ;;  %p252_p1 = scmp.lt.u32.totalorder %s248_s18, %s380_s0 }
   0x7   :  { %p254_p2 = pnand %p252_p1, %p249_p0 }
   0x9   :  { %257 = shalt.err (!%p254_p2)
}
   0xa   :  { %s258_s23 = scalar_lea.vmem %s18_s13, 16  ;;  %s262_s24 = scalar_lea.vmem %s18_s13, 32 }
   0xb   :  { %p259_p3 = scmp.ne.s32.totalorder %s18_s13, %s258_s23  ;;  %p263_p4 = scmp.lt.s32.totalorder %s18_s13, %s18_s13 }
   0xc   :  { %p264_p5 = scmp.lt.s32.totalorder %s262_s24, %s258_s23 }
   0xe   :  { %p265_p6 = por %p264_p5, %p263_p4 }
  0x10   :  { %p266_p7 = pnand %p265_p6, %p259_p3 }
  0x12   :  { %269 = shalt.err (!%p266_p7)
}
  0x13   :  { %20 = dma.hbm_to_vmem [thread:$0]  %s380_s0, 16, %s18_s13, [#allocation3]  }
  0x14   :  { %s270_s29 = scalar_lea.hbm %s382_s2, 1024 }
  0x15   :  { %p271_p8 = scmp.ne.s32.totalorder %s382_s2, %s270_s29  ;;  %p274_p9 = scmp.lt.u32.totalorder %s270_s29, %s382_s2 }
  0x17   :  { %p276_p10 = pnand %p274_p9, %p271_p8 }
  0x19   :  { %279 = shalt.err (!%p276_p10)
}
  0x1a   :  { %s280_s7 = scalar_lea.vmem %s334_s15, 1024  ;;  %p285_p12 = scmp.lt.s32.totalorder %s334_s15, %s334_s15 }
  0x1b   :  { %p281_p11 = scmp.ne.s32.totalorder %s334_s15, %s280_s7  ;;  %p286_p13 = scmp.lt.s32.totalorder %s280_s7, %s280_s7 }
  0x1d   :  { %p287_p0 = por %p286_p13, %p285_p12 }
  0x1f   :  { %p288_p1 = pnand %p287_p0, %p281_p11 }
  0x21   :  { %291 = shalt.err (!%p288_p1)
}
  0x22   :  { %s310_s0 = smov 128   ;;  %s311_s8 = smov 8  }
  0x23   :  { %34 = dma.hbm_to_vmem [thread:$0]  %s382_s2, 1024, %s334_s15, [#allocation6], %s310_s0, %s310_s0, %s311_s8  }
  0x24   :  { %302 = dma.done.wait [#allocation3], 16  }
  0x25   :  { %303 = vsyncadd [#allocation3], 4294967280 }
  0x26   :  { %304 = dma.done.wait [#allocation6], 1024  }
  0x27   :  { %305 = vsyncadd [#allocation6], 4294966272  ;;  %v312_v0 = vmov 0   ;;  %v236_v1 = vld [vmem:[#allocation5 + $0x4] ss:$8 sps:$4 sm:$0xff]   ;;  %vm91_vm0 = vcmask 523264  }
  0x28   :  { %127 = vmatprep.mubr.bf16.mxu0 %v312_v0  ;;  %172 = vmatprep.mubr.bf16.mxu1 %v312_v0  ;;  %v238_v2 = vld [vmem:[#allocation5] ss:$8 sps:$4 sm:$0xff]   ;;  %v239_v3 = vld [vmem:[#allocation5 + $0x14] ss:$8 sps:$4 sm:$0xff]   ;;  %v241_v4 = vld [vmem:[#allocation5 + $0x10] ss:$8 sps:$4 sm:$0xff]  }
  0x29   :  { %95 = vmatprep.subr.bf16.mxu0 %v236_v1  ;;  %140 = vmatprep.subr.bf16.mxu1 %v236_v1  ;;  %v242_v5 = vld [vmem:[#allocation5 + $0x24] ss:$8 sps:$4 sm:$0xff]   ;;  %v244_v6 = vld [vmem:[#allocation5 + $0x20] ss:$8 sps:$4 sm:$0xff]   ;;  %v245_v7 = vld [vmem:[#allocation5 + $0x34] ss:$8 sps:$4 sm:$0xff]  }
  0x2a   :  { %96 = vmatpush1.bf16.msra.mxu0 %v238_v2  ;;  %141 = vmatpush1.bf16.msra.mxu1 %v238_v2  ;;  %v247_v8 = vld [vmem:[#allocation5 + $0x30] ss:$8 sps:$4 sm:$0xff]   ;;  %v50_v9 = vld [vmem:[#allocation2] sm:$0x1]  ;;  %vm189_vm1 = vcmask 1041408   ;;  %s292_s15 = scalar_lea.hbm %s383_s3, 16 }
  0x2b   :  { %97 = vmatprep.subr.bf16.mxu0 %v239_v3  ;;  %142 = vmatprep.subr.bf16.mxu1 %v239_v3  ;;  %v136_v10 = vld [vmem:[%s381_s1] sm:$0x1]  ;;  %p293_p2 = scmp.ne.s32.totalorder %s383_s3, %s292_s15  ;;  %p296_p3 = scmp.lt.u32.totalorder %s292_s15, %s383_s3 }
  0x2d   :  { %p298_p4 = pnand %p296_p3, %p293_p2 }
  0x2e   :  { %98 = vmatpush1.bf16.msra.mxu0 %v241_v4  ;;  %143 = vmatpush1.bf16.msra.mxu1 %v241_v4 }
  0x2f   :  { %99 = vmatprep.subr.bf16.mxu0 %v242_v5  ;;  %144 = vmatprep.subr.bf16.mxu1 %v242_v5 }
  0x32   :  { %100 = vmatpush1.bf16.msra.mxu0 %v244_v6  ;;  %145 = vmatpush1.bf16.msra.mxu1 %v244_v6 }
  0x33   :  { %101 = vmatprep.subr.bf16.mxu0 %v245_v7  ;;  %146 = vmatprep.subr.bf16.mxu1 %v245_v7 }
  0x36   :  { %102 = vmatpush1.bf16.msra.mxu0 %v247_v8  ;;  %147 = vmatpush1.bf16.msra.mxu1 %v247_v8 }
  0x39   :  { %226 = vmatmul.mubr.msk.bf16.vlgmr.msra.gmra.mrb[0].mxu0 %vm91_vm0, %v50_v9  ;;  %227 = vmatmul.mubr.msk.bf16.vlgmr.msra.gmra.mrb[0].mxu1 %vm91_vm0, %v136_v10 }
 0x10c   :  { %v129_v11 = vpop.f32.mrb[0].mxu0  ;;  %v174_v12 = vpop.f32.mrb[0].mxu1 }
 0x10d   :  { %v181_v13 = vmul.f32 %v129_v11, %v129_v11  ;;  %v184_v14 = vmul.f32 %v174_v12, %v174_v12  ;;  %v131_v15 = vpop.f32.mrb[1].mxu0  ;;  %v176_v16 = vpop.f32.mrb[1].mxu1 }
 0x10e   :  { %v182_v17 = vmul.f32 %v131_v15, %v131_v15  ;;  %v185_v18 = vmul.f32 %v176_v16, %v176_v16  ;;  %v133_v19 = vpop.f32.mrb[2].mxu0  ;;  %v178_v20 = vpop.f32.mrb[2].mxu1 }
 0x10f   :  { %v134_v21 = vpop.f32.mrb[3].mxu0  ;;  %v179_v22 = vpop.f32.mrb[3].mxu1 }
 0x110   :  { %v183_v23 = vadd.f32 %v182_v17, %v181_v13  ;;  %v186_v24 = vadd.f32 %v185_v18, %v184_v14 }
 0x112   :  { %v187_v25 = vsub.f32 %v183_v23, %v186_v24 }
 0x114   :  { %v188_v26 = vmul.f32 %v187_v25, %v187_v25 }
 0x116   :  { %v190_v27 = vsel %vm189_vm1, %v188_v26, 0.0 }
 0x117   :  { %191 = vadd.xlane.f32.xlu0 %v190_v27 }
 0x1a4   :  { %v192_v28 = vpop.xlane.xlu0 %191 }
 0x1a5   :  { %v193_v29 = vrot.slane %v192_v28, 4 }
 0x1a7   :  { %v194_v30 = vadd.f32 %v193_v29, %v192_v28 }
 0x1a9   :  { %v195_v31 = vrot.slane %v194_v30, 2 }
 0x1ab   :  { %v196_v32 = vadd.f32 %v195_v31, %v194_v30 }
 0x1ad   :  { %v197_v33 = vrot.slane %v196_v32, 1 }
 0x1af   :  { %v198_v34 = vadd.f32 %v197_v33, %v196_v32 }
 0x1b1   :  { %228 = vpush %v198_v34 }
 0x1e2   :  { %s229_s1 = spop %228 }
 0x1e3   :  { %s200_s12 = smul.f32 0.0045454544, %s229_s1 }
 0x1e5   :  { %202 = sst [smem:[#allocation7]] %s200_s12 }
 0x1e6   :  { %301 = shalt.err (!%p298_p4)
}
 0x1e7   :  { %s313_s20 = smov [#allocation7]  }
 0x1e8   :  { %210 = dma.smem_to_hbm %s313_s20, 16, %s383_s3, [#allocation4]  }
 0x1e9   :  { %306 = dma.done.wait [#allocation4], 16  }
 0x1ea   :  { %307 = vsyncadd [#allocation4], 4294967280 }
 0x1eb   :  { %214 = sfence }
 0x1ec   :  { %215 = vsyncpa [#allocation3], 1 }
 0x1ed   :  { %216 = vsyncpa [#allocation6], 1 }
 0x1ee   :  { %217 = vsyncpa [#allocation4], 1 }

</bundles_post_ra>
